<compile_context>
chip_gen: v7x
topology: tpu7x:2x2x1
jax: 0.10.0
libtpu: 0.0.40
codegen_flags: <defaults>
</compile_context>

<pallas_src>
import functools

import jax
import jax.numpy as jnp
from jax.experimental import pallas as pl
from jax.experimental.pallas import tpu as pltpu


# ----------------------------------------------------------------------------
# Fused forward kernel: the whole network is a chain of (BT, F) matmuls in VMEM.
# ----------------------------------------------------------------------------

def _fused_forward_kernel(*refs, program):
    """refs = (x_ref, *operand_refs, o_ref).

    `program` is a static tuple of (n_parts, relu) stage entries.  Per stage the
    operands are n_parts bf16 weight matrices (pool phases; 1 if no pool) followed
    by one f32 bias row.  The stage computes max_p(h @ M_p + b), then optional ReLU.
    """
    x_ref, o_ref = refs[0], refs[-1]
    h = x_ref[...].astype(jnp.bfloat16)                 # bf16 operands feed the MXU
    idx = 1
    n_stages = len(program)
    for si, (n_parts, relu) in enumerate(program):
        ms = refs[idx: idx + n_parts]
        b_ref = refs[idx + n_parts]
        idx += n_parts + 1
        b = b_ref[...]                                   # (1, F_out) f32
        y = jnp.dot(h, ms[0][...], preferred_element_type=jnp.float32) + b
        for m in ms[1:]:                                 # fused maxpool phases
            y = jnp.maximum(
                y, jnp.dot(h, m[...], preferred_element_type=jnp.float32) + b)
        if relu:                                         # single ReLU after the max
            y = jnp.maximum(y, 0.0)
        if si < n_stages - 1:
            h = y.astype(jnp.bfloat16)                   # bf16 inter-stage activation
        else:
            h = y                                        # keep head output in f32
    o_ref[...] = h.astype(o_ref.dtype)


def _pick_batch_tile(B):
    """Fill MXU rows; keep >=2 grid steps for large batches (v7x megacore)."""
    if B >= 512:
        return 256
    if B >= 256:
        return 128
    if B > 8:
        return min(128, 8 * ((B + 7) // 8))
    return B


def forward(packed, x):
    """x: (B, C_in, L) f32 (PyTorch NCW). Returns (B, nclass) f32."""
    operands, program, nclass, nclass_pad = packed
    B = x.shape[0]
    x_flat = x.reshape(B, -1).astype(jnp.float32)        # row-major == torch .view flatten
    F0 = x_flat.shape[1]
    BT = _pick_batch_tile(B)
    Bp = pl.cdiv(B, BT) * BT
    if Bp != B:                                          # pad batch to a tile multiple
        x_flat = jnp.pad(x_flat, ((0, Bp - B), (0, 0)))
    grid = (Bp // BT,)
    in_specs = [pl.BlockSpec((BT, F0), lambda g: (g, 0))]
    # Constant operands: whole-array blocks, same block every grid step.
    in_specs += [pl.BlockSpec(op.shape, lambda g: (0, 0)) for op in operands]
    kern = functools.partial(_fused_forward_kernel, program=program)
    out = pl.pallas_call(
        kern,
        out_shape=jax.ShapeDtypeStruct((Bp, nclass_pad), jnp.float32),
        grid=grid,
        in_specs=in_specs,
        out_specs=pl.BlockSpec((BT, nclass_pad), lambda g: (g, 0)),
        compiler_params=pltpu.CompilerParams(dimension_semantics=("parallel",)),
    )(x_flat, *operands)
    return out[:B, :nclass]


# ----------------------------------------------------------------------------
# Host-side parameter packing: conv -> circulant matmul, BN folded into weights,
# pool fused as phase column-splits, weights pre-cast to bf16, padded head.
# ----------------------------------------------------------------------------

def _conv_as_matmul(w, L, dilation):
    """Circular-'same' dilated Conv1d as a dense matrix: y_flat = x_flat @ M.

    w: (C_out, C_in, K) PyTorch layout. Returns M: (C_in*L, C_out*L) with both
    sides flattened channel-major (c*L + t), matching torch's .view flatten.
    y[o, t] = sum_{i,k} w[o,i,k] * x[i, (t + (k - pad)*dilation) mod L]
    """
    C_out, C_in, K = w.shape
    pad = (K - 1) // 2                                   # odd K => symmetric 'same' pad
    t = jnp.arange(L)
    shifts = (jnp.arange(K) - pad) * dilation            # (K,)
    src = (t[None, None, :] + shifts[:, None, None]) % L            # (K, 1, L_dst)
    smat = (t[None, :, None] == src).astype(jnp.float32)            # (K, L_src, L_dst)
    M = jnp.einsum("oik,kst->isot", w.astype(jnp.float32), smat)    # (C_in, L, C_out, L)
    return M.reshape(C_in * L, C_out * L)


def pack_params(params, config, L, nclass_pad=128):
    """Build the flat operand list + static stage program for the fused kernel."""
    operands, program = [], []

    def add_conv_stage(M, bias, L_cur, kpool):
        # M: (F_in, C*L_cur) f32 with BN scale already folded into its columns.
        if kpool == 1:
            parts, L_out = [M], L_cur
        else:
            F_in, CL = M.shape
            C = CL // L_cur
            L_out = L_cur // kpool
            M3 = M.reshape(F_in, C, L_cur)
            parts = [M3[:, :, p: p + L_out * kpool: kpool].reshape(F_in, C * L_out)
                     for p in range(kpool)]
        operands.extend([p.astype(jnp.bfloat16) for p in parts])
        operands.append(jnp.repeat(bias, L_out).reshape(1, -1).astype(jnp.float32))
        program.append((len(parts), True))
        return L_out

    cur_L = L
    # DilatedConvStack: banks ... then MaxPool1d after the last bank.
    banks = params["dilated"]
    kpool_d = config["dilated_conv"]["maxpool_kernel"]
    for bi, bank in enumerate(banks):
        Ms, biases = [], []
        for d, p in bank:
            w_folded = p["w"] * p["scale"][:, None, None]  # fold BN scale into weights
            Ms.append(_conv_as_matmul(w_folded, cur_L, d))
            biases.append(p["bias"])
        M = jnp.concatenate(Ms, axis=1)
        bias = jnp.concatenate(biases)
        kpool = kpool_d if bi == len(banks) - 1 else 1
        cur_L = add_conv_stage(M, bias, cur_L, kpool)

    # ConvStack1D: conv layers ... then MaxPool1d after the last one.
    convs = params["conv"]
    kpool_c = config["conv"]["maxpool_kernel"]
    for ci, p in enumerate(convs):
        w_folded = p["w"] * p["scale"][:, None, None]
        M = _conv_as_matmul(w_folded, cur_L, 1)
        kpool = kpool_c if ci == len(convs) - 1 else 1
        cur_L = add_conv_stage(M, p["bias"], cur_L, kpool)

    # StackLinear (Linear + ReLU per layer).
    for p in params["linear"]:
        operands.append(jnp.transpose(p["w"]).astype(jnp.bfloat16))
        operands.append(p["b"].reshape(1, -1).astype(jnp.float32))
        program.append((1, True))

    # linear_out, zero-padded to a lane-dense (128-wide) output head.
    p = params["linear_out"]
    nclass = config["nclass"]
    npad = max(nclass_pad, nclass)
    w_out = jnp.transpose(p["w"]).astype(jnp.float32)     # (F_in, nclass)
    b_out = p["b"].reshape(1, -1).astype(jnp.float32)
    w_out = jnp.pad(w_out, ((0, 0), (0, npad - nclass)))
    b_out = jnp.pad(b_out, ((0, 0), (0, npad - nclass)))
    operands.append(w_out.astype(jnp.bfloat16))
    operands.append(b_out)
    program.append((1, False))

    return operands, tuple(program), nclass, npad


# ----------------------------------------------------------------------------
# Deterministic parameter construction (glue)
# ----------------------------------------------------------------------------

def _fold_bn(conv_bias, gamma, beta, mean, var, eps=1e-5):
    scale = gamma / jnp.sqrt(var + eps)
    bias = beta - scale * mean + scale * conv_bias
    return scale, bias


def init_conv_bn(key, in_ch, out_ch, K):
    k1, k2, k3, k4, k5, k6 = jax.random.split(key, 6)
    w = 0.2 * jax.random.normal(k1, (out_ch, in_ch, K), jnp.float32)
    cb = 0.1 * jax.random.normal(k2, (out_ch,), jnp.float32)
    gamma = 1.0 + 0.1 * jax.random.normal(k3, (out_ch,), jnp.float32)
    beta = 0.1 * jax.random.normal(k4, (out_ch,), jnp.float32)
    mean = 0.1 * jax.random.normal(k5, (out_ch,), jnp.float32)
    var = 0.5 + 0.1 * jnp.abs(jax.random.normal(k6, (out_ch,), jnp.float32))
    scale, bias = _fold_bn(cb, gamma, beta, mean, var)
    return {"w": w, "scale": scale, "bias": bias}


def build_params(config, key):
    params = {"dilated": [], "conv": [], "linear": [], "linear_out": None}
    dcfg = config["dilated_conv"]
    for name in dcfg["layers"]:
        lcfg = dcfg["layers"][name]
        bank = []
        for d in lcfg["dilations"]:
            key, sub = jax.random.split(key)
            bank.append((d, init_conv_bn(sub, lcfg["in_ch"], lcfg["out_ch"],
                                         lcfg["kernel_size"])))
        params["dilated"].append(bank)
    ccfg = config["conv"]
    for name in ccfg["layers"]:
        lcfg = ccfg["layers"][name]
        key, sub = jax.random.split(key)
        params["conv"].append(init_conv_bn(sub, lcfg["in_ch"], lcfg["out_ch"],
                                           lcfg["kernel_size"]))
    ins, outs, _drop = config["linear"]
    for fi, fo in zip(ins, outs):
        key, k1, k2 = jax.random.split(key, 3)
        params["linear"].append({
            "w": 0.1 * jax.random.normal(k1, (fo, fi), jnp.float32),
            "b": 0.1 * jax.random.normal(k2, (fo,), jnp.float32),
        })
    key, k1, k2 = jax.random.split(key, 3)
    params["linear_out"] = {
        "w": 0.1 * jax.random.normal(k1, (config["nclass"], outs[-1]), jnp.float32),
        "b": 0.1 * jax.random.normal(k2, (config["nclass"],), jnp.float32),
    }
    return params


# ----------------------------------------------------------------------------
# Pure-JAX layer-by-layer reference (mirrors the original per-op forward, f32)
# ----------------------------------------------------------------------------

def reference_forward(params, x, config):
    def conv_bn_relu(h, w, scale, bias, dilation):
        C_out, _, K = w.shape
        pad = (K - 1) // 2
        y = jnp.zeros((h.shape[0], C_out, h.shape[2]), jnp.float32)
        for k in range(K):
            s = (k - pad) * dilation
            xs = jnp.roll(h, shift=-s, axis=2)           # xs[..., t] = h[..., (t+s) mod L]
            y = y + jnp.einsum("oi,bil->bol", w[:, :, k], xs)
        y = y * scale[None, :, None] + bias[None, :, None]
        return jnp.maximum(y, 0.0)

    def maxpool(h, k):
        B, C, L = h.shape
        Lo = L // k
        return jnp.max(h[:, :, : Lo * k].reshape(B, C, Lo, k), axis=-1)

    h = x
    for bank in params["dilated"]:
        h = jnp.concatenate(
            [conv_bn_relu(h, p["w"], p["scale"], p["bias"], d) for d, p in bank], axis=1)
    h = maxpool(h, config["dilated_conv"]["maxpool_kernel"])
    for p in params["conv"]:
        h = conv_bn_relu(h, p["w"], p["scale"], p["bias"], 1)
    h = maxpool(h, config["conv"]["maxpool_kernel"])
    h = h.reshape(h.shape[0], -1)
    for p in params["linear"]:
        h = jnp.maximum(h @ p["w"].T + p["b"], 0.0)
    p = params["linear_out"]
    return h @ p["w"].T + p["b"]


CONFIG = {
    "dilated_conv": {
        "layers": {
            "layer0": {"in_ch": 1, "out_ch": 4, "kernel_size": 3, "dilations": [1, 2, 4]},
            "layer1": {"in_ch": 12, "out_ch": 4, "kernel_size": 3, "dilations": [1, 2]},
        },
        "maxpool_kernel": 2,
    },
    "conv": {
        "layers": {
            "layer0": {"in_ch": 8, "out_ch": 8, "kernel_size": 3},
        },
        "maxpool_kernel": 2,
    },
    "linear": [[64, 32], [32, 16], [0.0, 0.0]],
    "nclass": 3,
}


if __name__ == "__main__":
    key = jax.random.PRNGKey(0)
    key, pkey, xkey = jax.random.split(key, 3)
    params = build_params(CONFIG, pkey)
    # input: (batch=2, channels=1, length=32)  -- PyTorch Conv1d NCW convention
    x = jax.random.normal(xkey, (2, 1, 32), jnp.float32)

    packed = pack_params(params, CONFIG, L=x.shape[-1])   # host-side, once
    out = forward(packed, x)
    out = jax.block_until_ready(out)
    assert out.shape == (2, CONFIG["nclass"]), out.shape

    ref = reference_forward(params, x, CONFIG)
    # bf16 matmul operands / inter-stage activations => loosen tolerance accordingly.
    err = jnp.max(jnp.abs(out - ref))
    assert jnp.allclose(out, ref, rtol=5e-2, atol=5e-2), (err, out, ref)
    print("KERNEL_OK")
</pallas_src>

<mosaic_0001>
module attributes {stable_mosaic.version = 11 : i64} {
  func.func @_fused_forward_kernel(%arg0: i32, %arg1: memref<2x32xf32, #tpu.memory_space<vmem>>, %arg2: memref<32x384xbf16, #tpu.memory_space<vmem>>, %arg3: memref<1x384xf32, #tpu.memory_space<vmem>>, %arg4: memref<384x128xbf16, #tpu.memory_space<vmem>>, %arg5: memref<384x128xbf16, #tpu.memory_space<vmem>>, %arg6: memref<1x128xf32, #tpu.memory_space<vmem>>, %arg7: memref<128x64xbf16, #tpu.memory_space<vmem>>, %arg8: memref<128x64xbf16, #tpu.memory_space<vmem>>, %arg9: memref<1x64xf32, #tpu.memory_space<vmem>>, %arg10: memref<64x32xbf16, #tpu.memory_space<vmem>>, %arg11: memref<1x32xf32, #tpu.memory_space<vmem>>, %arg12: memref<32x16xbf16, #tpu.memory_space<vmem>>, %arg13: memref<1x16xf32, #tpu.memory_space<vmem>>, %arg14: memref<16x128xbf16, #tpu.memory_space<vmem>>, %arg15: memref<1x128xf32, #tpu.memory_space<vmem>>, %arg16: memref<2x128xf32, #tpu.memory_space<vmem>>) attributes {dimension_semantics = [#tpu.dimension_semantics<parallel>], iteration_bounds = array<i64: 1>, scalar_prefetch = 0 : i64, scratch_operands = 0 : i64, tpu.core_type = #tpu.core_type<tc>, window_params = [{transform_indices = @transform_0, window_bounds = array<i64: 2, 32>}, {pipeline_mode = #tpu.pipeline_mode<synchronous>, transform_indices = @transform_1, window_bounds = array<i64: 32, 384>}, {pipeline_mode = #tpu.pipeline_mode<synchronous>, transform_indices = @transform_2, window_bounds = array<i64: 1, 384>}, {pipeline_mode = #tpu.pipeline_mode<synchronous>, transform_indices = @transform_3, window_bounds = array<i64: 384, 128>}, {pipeline_mode = #tpu.pipeline_mode<synchronous>, transform_indices = @transform_4, window_bounds = array<i64: 384, 128>}, {pipeline_mode = #tpu.pipeline_mode<synchronous>, transform_indices = @transform_5, window_bounds = array<i64: 1, 128>}, {pipeline_mode = #tpu.pipeline_mode<synchronous>, transform_indices = @transform_6, window_bounds = array<i64: 128, 64>}, {pipeline_mode = #tpu.pipeline_mode<synchronous>, transform_indices = @transform_7, window_bounds = array<i64: 128, 64>}, {pipeline_mode = #tpu.pipeline_mode<synchronous>, transform_indices = @transform_8, window_bounds = array<i64: 1, 64>}, {pipeline_mode = #tpu.pipeline_mode<synchronous>, transform_indices = @transform_9, window_bounds = array<i64: 64, 32>}, {pipeline_mode = #tpu.pipeline_mode<synchronous>, transform_indices = @transform_10, window_bounds = array<i64: 1, 32>}, {pipeline_mode = #tpu.pipeline_mode<synchronous>, transform_indices = @transform_11, window_bounds = array<i64: 32, 16>}, {pipeline_mode = #tpu.pipeline_mode<synchronous>, transform_indices = @transform_12, window_bounds = array<i64: 1, 16>}, {pipeline_mode = #tpu.pipeline_mode<synchronous>, transform_indices = @transform_13, window_bounds = array<i64: 16, 128>}, {pipeline_mode = #tpu.pipeline_mode<synchronous>, transform_indices = @transform_14, window_bounds = array<i64: 1, 128>}, {transform_indices = @transform_15, window_bounds = array<i64: 2, 128>}]} {
    %c0 = arith.constant 0 : index
    %c0_0 = arith.constant 0 : index
    %0 = vector.load %arg1[%c0, %c0_0] : memref<2x32xf32, #tpu.memory_space<vmem>>, vector<2x32xf32>
    %1 = arith.truncf %0 : vector<2x32xf32> to vector<2x32xbf16>
    %c0_1 = arith.constant 0 : index
    %c0_2 = arith.constant 0 : index
    %2 = vector.load %arg3[%c0_1, %c0_2] : memref<1x384xf32, #tpu.memory_space<vmem>>, vector<1x384xf32>
    %c0_3 = arith.constant 0 : index
    %c0_4 = arith.constant 0 : index
    %3 = vector.load %arg2[%c0_3, %c0_4] : memref<32x384xbf16, #tpu.memory_space<vmem>>, vector<32x384xbf16>
    %cst = arith.constant dense<0.000000e+00> : vector<2x384xf32>
    %4 = tpu.matmul %1, %3, %cst {dimension_numbers = #tpu.dot_dimension_numbers<[1], [0], [0], [1], [0, 0, 1, 1], [], []>} : vector<2x32xbf16>, vector<32x384xbf16>, vector<2x384xf32> -> vector<2x384xf32>
    %5 = vector.broadcast %2 : vector<1x384xf32> to vector<2x384xf32>
    %6 = arith.addf %4, %5 : vector<2x384xf32>
    %cst_5 = arith.constant 0.000000e+00 : f32
    %7 = vector.broadcast %cst_5 : f32 to vector<2x384xf32>
    %8 = arith.maximumf %6, %7 : vector<2x384xf32>
    %9 = arith.truncf %8 : vector<2x384xf32> to vector<2x384xbf16>
    %c0_6 = arith.constant 0 : index
    %c0_7 = arith.constant 0 : index
    %10 = vector.load %arg6[%c0_6, %c0_7] : memref<1x128xf32, #tpu.memory_space<vmem>>, vector<1x128xf32>
    %c0_8 = arith.constant 0 : index
    %c0_9 = arith.constant 0 : index
    %11 = vector.load %arg4[%c0_8, %c0_9] : memref<384x128xbf16, #tpu.memory_space<vmem>>, vector<384x128xbf16>
    %cst_10 = arith.constant dense<0.000000e+00> : vector<2x128xf32>
    %12 = tpu.matmul %9, %11, %cst_10 {dimension_numbers = #tpu.dot_dimension_numbers<[1], [0], [0], [1], [0, 0, 1, 1], [], []>} : vector<2x384xbf16>, vector<384x128xbf16>, vector<2x128xf32> -> vector<2x128xf32>
    %13 = vector.broadcast %10 : vector<1x128xf32> to vector<2x128xf32>
    %14 = arith.addf %12, %13 : vector<2x128xf32>
    %c0_11 = arith.constant 0 : index
    %c0_12 = arith.constant 0 : index
    %15 = vector.load %arg5[%c0_11, %c0_12] : memref<384x128xbf16, #tpu.memory_space<vmem>>, vector<384x128xbf16>
    %cst_13 = arith.constant dense<0.000000e+00> : vector<2x128xf32>
    %16 = tpu.matmul %9, %15, %cst_13 {dimension_numbers = #tpu.dot_dimension_numbers<[1], [0], [0], [1], [0, 0, 1, 1], [], []>} : vector<2x384xbf16>, vector<384x128xbf16>, vector<2x128xf32> -> vector<2x128xf32>
    %17 = vector.broadcast %10 : vector<1x128xf32> to vector<2x128xf32>
    %18 = arith.addf %16, %17 : vector<2x128xf32>
    %19 = arith.maximumf %14, %18 : vector<2x128xf32>
    %cst_14 = arith.constant 0.000000e+00 : f32
    %20 = vector.broadcast %cst_14 : f32 to vector<2x128xf32>
    %21 = arith.maximumf %19, %20 : vector<2x128xf32>
    %22 = arith.truncf %21 : vector<2x128xf32> to vector<2x128xbf16>
    %c0_15 = arith.constant 0 : index
    %c0_16 = arith.constant 0 : index
    %23 = vector.load %arg9[%c0_15, %c0_16] : memref<1x64xf32, #tpu.memory_space<vmem>>, vector<1x64xf32>
    %c0_17 = arith.constant 0 : index
    %c0_18 = arith.constant 0 : index
    %24 = vector.load %arg7[%c0_17, %c0_18] : memref<128x64xbf16, #tpu.memory_space<vmem>>, vector<128x64xbf16>
    %cst_19 = arith.constant dense<0.000000e+00> : vector<2x64xf32>
    %25 = tpu.matmul %22, %24, %cst_19 {dimension_numbers = #tpu.dot_dimension_numbers<[1], [0], [0], [1], [0, 0, 1, 1], [], []>} : vector<2x128xbf16>, vector<128x64xbf16>, vector<2x64xf32> -> vector<2x64xf32>
    %26 = vector.broadcast %23 : vector<1x64xf32> to vector<2x64xf32>
    %27 = arith.addf %25, %26 : vector<2x64xf32>
    %c0_20 = arith.constant 0 : index
    %c0_21 = arith.constant 0 : index
    %28 = vector.load %arg8[%c0_20, %c0_21] : memref<128x64xbf16, #tpu.memory_space<vmem>>, vector<128x64xbf16>
    %cst_22 = arith.constant dense<0.000000e+00> : vector<2x64xf32>
    %29 = tpu.matmul %22, %28, %cst_22 {dimension_numbers = #tpu.dot_dimension_numbers<[1], [0], [0], [1], [0, 0, 1, 1], [], []>} : vector<2x128xbf16>, vector<128x64xbf16>, vector<2x64xf32> -> vector<2x64xf32>
    %30 = vector.broadcast %23 : vector<1x64xf32> to vector<2x64xf32>
    %31 = arith.addf %29, %30 : vector<2x64xf32>
    %32 = arith.maximumf %27, %31 : vector<2x64xf32>
    %cst_23 = arith.constant 0.000000e+00 : f32
    %33 = vector.broadcast %cst_23 : f32 to vector<2x64xf32>
    %34 = arith.maximumf %32, %33 : vector<2x64xf32>
    %35 = arith.truncf %34 : vector<2x64xf32> to vector<2x64xbf16>
    %c0_24 = arith.constant 0 : index
    %c0_25 = arith.constant 0 : index
    %36 = vector.load %arg11[%c0_24, %c0_25] : memref<1x32xf32, #tpu.memory_space<vmem>>, vector<1x32xf32>
    %c0_26 = arith.constant 0 : index
    %c0_27 = arith.constant 0 : index
    %37 = vector.load %arg10[%c0_26, %c0_27] : memref<64x32xbf16, #tpu.memory_space<vmem>>, vector<64x32xbf16>
    %cst_28 = arith.constant dense<0.000000e+00> : vector<2x32xf32>
    %38 = tpu.matmul %35, %37, %cst_28 {dimension_numbers = #tpu.dot_dimension_numbers<[1], [0], [0], [1], [0, 0, 1, 1], [], []>} : vector<2x64xbf16>, vector<64x32xbf16>, vector<2x32xf32> -> vector<2x32xf32>
    %39 = vector.broadcast %36 : vector<1x32xf32> to vector<2x32xf32>
    %40 = arith.addf %38, %39 : vector<2x32xf32>
    %cst_29 = arith.constant 0.000000e+00 : f32
    %41 = vector.broadcast %cst_29 : f32 to vector<2x32xf32>
    %42 = arith.maximumf %40, %41 : vector<2x32xf32>
    %43 = arith.truncf %42 : vector<2x32xf32> to vector<2x32xbf16>
    %c0_30 = arith.constant 0 : index
    %c0_31 = arith.constant 0 : index
    %44 = vector.load %arg13[%c0_30, %c0_31] : memref<1x16xf32, #tpu.memory_space<vmem>>, vector<1x16xf32>
    %c0_32 = arith.constant 0 : index
    %c0_33 = arith.constant 0 : index
    %45 = vector.load %arg12[%c0_32, %c0_33] : memref<32x16xbf16, #tpu.memory_space<vmem>>, vector<32x16xbf16>
    %cst_34 = arith.constant dense<0.000000e+00> : vector<2x16xf32>
    %46 = tpu.matmul %43, %45, %cst_34 {dimension_numbers = #tpu.dot_dimension_numbers<[1], [0], [0], [1], [0, 0, 1, 1], [], []>} : vector<2x32xbf16>, vector<32x16xbf16>, vector<2x16xf32> -> vector<2x16xf32>
    %47 = vector.broadcast %44 : vector<1x16xf32> to vector<2x16xf32>
    %48 = arith.addf %46, %47 : vector<2x16xf32>
    %cst_35 = arith.constant 0.000000e+00 : f32
    %49 = vector.broadcast %cst_35 : f32 to vector<2x16xf32>
    %50 = arith.maximumf %48, %49 : vector<2x16xf32>
    %51 = arith.truncf %50 : vector<2x16xf32> to vector<2x16xbf16>
    %c0_36 = arith.constant 0 : index
    %c0_37 = arith.constant 0 : index
    %52 = vector.load %arg15[%c0_36, %c0_37] : memref<1x128xf32, #tpu.memory_space<vmem>>, vector<1x128xf32>
    %c0_38 = arith.constant 0 : index
    %c0_39 = arith.constant 0 : index
    %53 = vector.load %arg14[%c0_38, %c0_39] : memref<16x128xbf16, #tpu.memory_space<vmem>>, vector<16x128xbf16>
    %cst_40 = arith.constant dense<0.000000e+00> : vector<2x128xf32>
    %54 = tpu.matmul %51, %53, %cst_40 {dimension_numbers = #tpu.dot_dimension_numbers<[1], [0], [0], [1], [0, 0, 1, 1], [], []>} : vector<2x16xbf16>, vector<16x128xbf16>, vector<2x128xf32> -> vector<2x128xf32>
    %55 = vector.broadcast %52 : vector<1x128xf32> to vector<2x128xf32>
    %56 = arith.addf %54, %55 : vector<2x128xf32>
    %c0_41 = arith.constant 0 : index
    %c0_42 = arith.constant 0 : index
    %57 = vector.load %arg16[%c0_41, %c0_42] : memref<2x128xf32, #tpu.memory_space<vmem>>, vector<2x128xf32>
    tpu.vector_store %arg16[%c0_41, %c0_42], %56 {strides = array<i32>} : memref<2x128xf32, #tpu.memory_space<vmem>>, vector<2x128xf32>,
    return
  }
  func.func @transform_0(%arg0: i32) -> (i32, i32) {
    %c0_i32 = arith.constant 0 : i32
    %c0_i32_0 = arith.constant 0 : i32
    return %arg0, %c0_i32 : i32, i32
  }
  func.func @transform_1(%arg0: i32) -> (i32, i32) {
    %c0_i32 = arith.constant 0 : i32
    %c0_i32_0 = arith.constant 0 : i32
    %c0_i32_1 = arith.constant 0 : i32
    return %c0_i32, %c0_i32_0 : i32, i32
  }
  func.func @transform_2(%arg0: i32) -> (i32, i32) {
    %c0_i32 = arith.constant 0 : i32
    %c0_i32_0 = arith.constant 0 : i32
    %c0_i32_1 = arith.constant 0 : i32
    return %c0_i32, %c0_i32_0 : i32, i32
  }
  func.func @transform_3(%arg0: i32) -> (i32, i32) {
    %c0_i32 = arith.constant 0 : i32
    %c0_i32_0 = arith.constant 0 : i32
    %c0_i32_1 = arith.constant 0 : i32
    return %c0_i32, %c0_i32_0 : i32, i32
  }
  func.func @transform_4(%arg0: i32) -> (i32, i32) {
    %c0_i32 = arith.constant 0 : i32
    %c0_i32_0 = arith.constant 0 : i32
    %c0_i32_1 = arith.constant 0 : i32
    return %c0_i32, %c0_i32_0 : i32, i32
  }
  func.func @transform_5(%arg0: i32) -> (i32, i32) {
    %c0_i32 = arith.constant 0 : i32
    %c0_i32_0 = arith.constant 0 : i32
    %c0_i32_1 = arith.constant 0 : i32
    return %c0_i32, %c0_i32_0 : i32, i32
  }
  func.func @transform_6(%arg0: i32) -> (i32, i32) {
    %c0_i32 = arith.constant 0 : i32
    %c0_i32_0 = arith.constant 0 : i32
    %c0_i32_1 = arith.constant 0 : i32
    return %c0_i32, %c0_i32_0 : i32, i32
  }
  func.func @transform_7(%arg0: i32) -> (i32, i32) {
    %c0_i32 = arith.constant 0 : i32
    %c0_i32_0 = arith.constant 0 : i32
    %c0_i32_1 = arith.constant 0 : i32
    return %c0_i32, %c0_i32_0 : i32, i32
  }
  func.func @transform_8(%arg0: i32) -> (i32, i32) {
    %c0_i32 = arith.constant 0 : i32
    %c0_i32_0 = arith.constant 0 : i32
    %c0_i32_1 = arith.constant 0 : i32
    return %c0_i32, %c0_i32_0 : i32, i32
  }
  func.func @transform_9(%arg0: i32) -> (i32, i32) {
    %c0_i32 = arith.constant 0 : i32
    %c0_i32_0 = arith.constant 0 : i32
    %c0_i32_1 = arith.constant 0 : i32
    return %c0_i32, %c0_i32_0 : i32, i32
  }
  func.func @transform_10(%arg0: i32) -> (i32, i32) {
    %c0_i32 = arith.constant 0 : i32
    %c0_i32_0 = arith.constant 0 : i32
    %c0_i32_1 = arith.constant 0 : i32
    return %c0_i32, %c0_i32_0 : i32, i32
  }
  func.func @transform_11(%arg0: i32) -> (i32, i32) {
    %c0_i32 = arith.constant 0 : i32
    %c0_i32_0 = arith.constant 0 : i32
    %c0_i32_1 = arith.constant 0 : i32
    return %c0_i32, %c0_i32_0 : i32, i32
  }
  func.func @transform_12(%arg0: i32) -> (i32, i32) {
    %c0_i32 = arith.constant 0 : i32
    %c0_i32_0 = arith.constant 0 : i32
    %c0_i32_1 = arith.constant 0 : i32
    return %c0_i32, %c0_i32_0 : i32, i32
  }
  func.func @transform_13(%arg0: i32) -> (i32, i32) {
    %c0_i32 = arith.constant 0 : i32
    %c0_i32_0 = arith.constant 0 : i32
    %c0_i32_1 = arith.constant 0 : i32
    return %c0_i32, %c0_i32_0 : i32, i32
  }
  func.func @transform_14(%arg0: i32) -> (i32, i32) {
    %c0_i32 = arith.constant 0 : i32
    %c0_i32_0 = arith.constant 0 : i32
    %c0_i32_1 = arith.constant 0 : i32
    return %c0_i32, %c0_i32_0 : i32, i32
  }
  func.func @transform_15(%arg0: i32) -> (i32, i32) {
    %c0_i32 = arith.constant 0 : i32
    %c0_i32_0 = arith.constant 0 : i32
    return %arg0, %c0_i32 : i32, i32
  }
}

</mosaic_0001>

<bundles_post_ra>
// kernel: tpu_custom_call.1
= control target key start
LH: loop header
LB: loop body
LE: loop exit
PB: predicated region body
PF: predicated region fallthrough
CT: control target
= control target key end

     0   :  { %20 = vsyncpa [#allocation3], 0  ;;  %s2186_s0 = inlined_call_operand.hbm [shape: f32[2,32], index: 0, kind: input, shape index: {}]   ;;  %s2187_s1 = inlined_call_operand.vmem [shape: bf16[32,384], index: 1, kind: input, shape index: {}]   ;;  %s2188_s2 = inlined_call_operand.hbm [shape: f32[1,384], index: 2, kind: input, shape index: {}]   ;;  %s2189_s3 = inlined_call_operand.vmem [shape: bf16[384,128], index: 3, kind: input, shape index: {}]   ;;  %s2190_s4 = inlined_call_operand.hbm [shape: bf16[384,128], index: 4, kind: input, shape index: {}]   ;;  %s2191_s5 = inlined_call_operand.vmem [shape: f32[1,128], index: 5, kind: input, shape index: {}]   ;;  %s2192_s6 = inlined_call_operand.vmem [shape: bf16[128,64], index: 6, kind: input, shape index: {}]   ;;  %s2193_s7 = inlined_call_operand.vmem [shape: bf16[128,64], index: 7, kind: input, shape index: {}]   ;;  %s2194_s8 = inlined_call_operand.hbm [shape: f32[1,64], index: 8, kind: input, shape index: {}]   ;;  %s2195_s9 = inlined_call_operand.vmem [shape: bf16[64,32], index: 9, kind: input, shape index: {}]   ;;  %s2196_s10 = inlined_call_operand.hbm [shape: f32[1,32], index: 10, kind: input, shape index: {}]   ;;  %s2197_s11 = inlined_call_operand.vmem [shape: bf16[32,16], index: 11, kind: input, shape index: {}]   ;;  %s2198_s12 = inlined_call_operand.vmem [shape: f32[1,16], index: 12, kind: input, shape index: {}]   ;;  %s2199_s13 = inlined_call_operand.vmem [shape: bf16[16,128], index: 13, kind: input, shape index: {}]   ;;  %s2200_s14 = inlined_call_operand.vmem [shape: f32[1,128], index: 14, kind: input, shape index: {}]   ;;  %s2201_s15 = inlined_call_operand.hbm [shape: f32[2,128], index: 15, kind: output, shape index: {}]  }
   0x1   :  { %21 = vsyncpa [#allocation6], 0 }
   0x2   :  { %22 = vsyncpa [#allocation9], 0 }
   0x3   :  { %23 = vsyncpa [#allocation4], 0  ;;  %s1788_s18 = smov [#allocation5]   ;;  %s1789_s20 = smov [#allocation8]  }
   0x4   :  { %s42_s19 = sshll.u32 %s1788_s18, 4  ;;  %s72_s21 = sshll.u32 %s1789_s20, 4  ;;  %s43_s19 = int_to_ptr.vmem [resolvable:$true] %s42_s19  ;;  %s73_s21 = int_to_ptr.vmem [resolvable:$true] %s72_s21 }
   0x5   :  { %s1648_s24 = scalar_lea.hbm %s2188_s2, 48 }
   0x6   :  { %p1649_p0 = scmp.ne.s32.totalorder %s2188_s2, %s1648_s24  ;;  %p1652_p1 = scmp.lt.u32.totalorder %s1648_s24, %s2188_s2 }
   0x8   :  { %p1654_p2 = pnand %p1652_p1, %p1649_p0 }
   0xa   :  { %1657 = shalt.err (!%p1654_p2)
}
   0xb   :  { %s1658_s29 = scalar_lea.vmem %s43_s19, 48  ;;  %s1662_s30 = scalar_lea.vmem %s43_s19, 64 }
   0xc   :  { %p1659_p3 = scmp.ne.s32.totalorder %s43_s19, %s1658_s29  ;;  %p1663_p4 = scmp.lt.s32.totalorder %s43_s19, %s43_s19 }
   0xd   :  { %p1664_p5 = scmp.lt.s32.totalorder %s1662_s30, %s1658_s29 }
   0xf   :  { %p1665_p6 = por %p1664_p5, %p1663_p4 }
  0x11   :  { %p1666_p7 = pnand %p1665_p6, %p1659_p3 }
  0x13   :  { %1669 = shalt.err (!%p1666_p7)
}
  0x14   :  { %45 = dma.hbm_to_vmem [thread:$0]  %s2188_s2, 48, %s43_s19, [#allocation6]  }
  0x15   :  { %s1670_s22 = scalar_lea.hbm %s2194_s8, 16 }
  0x16   :  { %p1671_p8 = scmp.ne.s32.totalorder %s2194_s8, %s1670_s22  ;;  %p1674_p9 = scmp.lt.u32.totalorder %s1670_s22, %s2194_s8 }
  0x18   :  { %p1676_p10 = pnand %p1674_p9, %p1671_p8 }
  0x1a   :  { %1679 = shalt.err (!%p1676_p10)
}
  0x1b   :  { %s1680_s27 = scalar_lea.vmem %s73_s21, 16  ;;  %s1684_s28 = scalar_lea.vmem %s73_s21, 32 }
  0x1c   :  { %p1681_p11 = scmp.ne.s32.totalorder %s73_s21, %s1680_s27  ;;  %p1685_p12 = scmp.lt.s32.totalorder %s73_s21, %s73_s21 }
  0x1d   :  { %p1686_p13 = scmp.lt.s32.totalorder %s1684_s28, %s1680_s27 }
  0x1f   :  { %p1687_p0 = por %p1686_p13, %p1685_p12 }
  0x21   :  { %p1688_p1 = pnand %p1687_p0, %p1681_p11 }
  0x23   :  { %1691 = shalt.err (!%p1688_p1)
}
  0x24   :  { %75 = dma.hbm_to_vmem [thread:$0]  %s2194_s8, 16, %s73_s21, [#allocation9]  }
  0x25   :  { %s1790_s29 = smov [#allocation2]   ;;  %s1791_s16 = smov [#allocation7]  }
  0x26   :  { %s30_s30 = sshll.u32 %s1790_s29, 4  ;;  %s53_s17 = sshll.u32 %s1791_s16, 4  ;;  %s31_s30 = int_to_ptr.vmem [resolvable:$true] %s30_s30  ;;  %s1903_s17 = int_to_ptr.vmem [resolvable:$true] %s53_s17 }
  0x27   :  { %s1692_s22 = scalar_lea.hbm %s2186_s0, 32 }
  0x28   :  { %p1693_p2 = scmp.ne.s32.totalorder %s2186_s0, %s1692_s22  ;;  %p1696_p3 = scmp.lt.u32.totalorder %s1692_s22, %s2186_s0 }
  0x2a   :  { %p1698_p4 = pnand %p1696_p3, %p1693_p2 }
  0x2c   :  { %1701 = shalt.err (!%p1698_p4)
}
  0x2d   :  { %s1702_s8 = scalar_lea.vmem %s31_s30, 32  ;;  %p1707_p6 = scmp.lt.s32.totalorder %s31_s30, %s31_s30 }
  0x2e   :  { %p1703_p5 = scmp.ne.s32.totalorder %s31_s30, %s1702_s8  ;;  %p1708_p7 = scmp.lt.s32.totalorder %s1702_s8, %s1702_s8 }
  0x30   :  { %p1709_p8 = por %p1708_p7, %p1707_p6 }
  0x32   :  { %p1710_p9 = pnand %p1709_p8, %p1703_p5 }
  0x34   :  { %1713 = shalt.err (!%p1710_p9)
}
  0x35   :  { %33 = dma.hbm_to_vmem [thread:$0]  %s2186_s0, 32, %s31_s30, [#allocation3]  }
  0x36   :  { %s1714_s19 = scalar_lea.hbm %s2190_s4, 3072 }
  0x37   :  { %p1715_p10 = scmp.ne.s32.totalorder %s2190_s4, %s1714_s19  ;;  %p1718_p11 = scmp.lt.u32.totalorder %s1714_s19, %s2190_s4 }
  0x39   :  { %p1720_p12 = pnand %p1718_p11, %p1715_p10 }
  0x3b   :  { %1723 = shalt.err (!%p1720_p12)
}
  0x3c   :  { %s1724_s22 = scalar_lea.vmem %s1903_s17, 3072  ;;  %p1729_p0 = scmp.lt.s32.totalorder %s1903_s17, %s1903_s17 }
  0x3d   :  { %p1725_p13 = scmp.ne.s32.totalorder %s1903_s17, %s1724_s22  ;;  %p1730_p1 = scmp.lt.s32.totalorder %s1724_s22, %s1724_s22 }
  0x3f   :  { %p1731_p2 = por %p1730_p1, %p1729_p0 }
  0x41   :  { %p1732_p3 = pnand %p1731_p2, %p1725_p13 }
  0x43   :  { %1735 = shalt.err (!%p1732_p3)
}
  0x44   :  { %s1792_s0 = smov 64   ;;  %s1793_s30 = smov 4  }
  0x45   :  { %59 = dma.hbm_to_vmem [thread:$0]  %s2190_s4, 3072, %s1903_s17, [#allocation6], %s1792_s0, %s1792_s0, %s1793_s30  }
  0x46   :  { %s1794_s25 = smov [#allocation10]   ;;  %s1736_s27 = scalar_lea.hbm %s2196_s10, 16 }
  0x47   :  { %s84_s26 = sshll.u32 %s1794_s25, 4  ;;  %p1737_p4 = scmp.ne.s32.totalorder %s2196_s10, %s1736_s27  ;;  %s85_s26 = int_to_ptr.vmem [resolvable:$true] %s84_s26 }
  0x48   :  { %p1740_p5 = scmp.lt.u32.totalorder %s1736_s27, %s2196_s10 }
  0x4a   :  { %p1742_p6 = pnand %p1740_p5, %p1737_p4 }
  0x4c   :  { %1745 = shalt.err (!%p1742_p6)
}
  0x4d   :  { %s1746_s16 = scalar_lea.vmem %s85_s26, 16  ;;  %s1750_s4 = scalar_lea.vmem %s85_s26, 32 }
  0x4e   :  { %p1747_p7 = scmp.ne.s32.totalorder %s85_s26, %s1746_s16  ;;  %p1751_p8 = scmp.lt.s32.totalorder %s85_s26, %s85_s26 }
  0x4f   :  { %p1752_p9 = scmp.lt.s32.totalorder %s1750_s4, %s1746_s16 }
  0x51   :  { %p1753_p10 = por %p1752_p9, %p1751_p8 }
  0x53   :  { %p1754_p11 = pnand %p1753_p10, %p1747_p7 }
  0x55   :  { %1757 = shalt.err (!%p1754_p11)
}
  0x56   :  { %87 = dma.hbm_to_vmem [thread:$0]  %s2196_s10, 16, %s85_s26, [#allocation9]  }
  0x57   :  { %1780 = dma.done.wait [#allocation3], 32  }
  0x58   :  { %1781 = vsyncadd [#allocation3], 4294967264 }
  0x59   :  { %1782 = dma.done.wait [#allocation6], 3120  }
  0x5a   :  { %1783 = vsyncadd [#allocation6], 4294964176 }
  0x5b   :  { %1784 = dma.done.wait [#allocation9], 32  }
  0x5c   :  { %1785 = vsyncadd [#allocation9], 4294967264  ;;  %v1795_v0 = vmov 0.0   ;;  %vm1796_vm0 = vmmov 0   ;;  %v1797_v1 = vmov 0   ;;  %v1578_v10 = vld [vmem:[%s2189_s3 + $0x40] sm:$0xff]   ;;  %v124_v35 = vlaneseq }
  0x5d   :  { %1444 = vmatprep.subr.bf16.mxu1 %v1795_v0  ;;  %1448 = vmatprep.mubr.msk.bf16.mxu1 %vm1796_vm0, %v1795_v0  ;;  %v1569_v2 = vld [vmem:[%s2187_s1 + $0x4] ss:$12 sps:$4 sm:$0xff]   ;;  %v1571_v3 = vld [vmem:[%s2187_s1 + $0x8] ss:$12 sps:$4 sm:$0xff]   ;;  %v1572_v4 = vld [vmem:[%s2187_s1] ss:$12 sps:$4 sm:$0xff]  }
  0x5e   :  { %207 = vmatprep.mubr.bf16.mxu0 %v1797_v1  ;;  %175 = vmatprep.subr.bf16.mxu0 %v1569_v2  ;;  %v1573_v5 = vld [vmem:[%s2187_s1 + $0x1c] ss:$12 sps:$4 sm:$0xff]   ;;  %v1575_v6 = vld [vmem:[%s2187_s1 + $0x20] ss:$12 sps:$4 sm:$0xff]   ;;  %v1576_v7 = vld [vmem:[%s2187_s1 + $0x18] ss:$12 sps:$4 sm:$0xff]  }
  0x5f   :  { %1445 = vmatpush3.bf16.msra.mxu1 %v1571_v3  ;;  %176 = vmatpush1.bf16.msra.mxu0 %v1572_v4  ;;  %v112_v8 = vld [vmem:[#allocation2] sm:$0x3]  ;;  %vm171_vm1 = vcmask 261120   ;;  %v1581_v13 = vld [vmem:[%s2189_s3 + $0x48] sm:$0xff]   ;;  %v1584_v16 = vld [vmem:[%s2189_s3 + $0x50] sm:$0xff]   ;;  %v125_v36 = vshrl.u32 %v124_v35, 7 }
  0x60   :  { %1446 = vmatprep.subr.bf16.mxu1 %v1795_v0  ;;  %177 = vmatprep.subr.bf16.mxu0 %v1573_v5  ;;  %v113_v9 = vpack.c.bf16 %v112_v8, %v112_v8  ;;  %v1577_v11 = vld [vmem:[%s2189_s3 + $0x80] sm:$0xff]   ;;  %v1580_v14 = vld [vmem:[%s2189_s3 + $0x88] sm:$0xff]   ;;  %v1583_v17 = vld [vmem:[%s2189_s3 + $0x90] sm:$0xff]   ;;  %vm1073_vm2 = vcmask 523264   ;;  %vm1202_vm3 = vcmask 130048   ;;  %s1798_s17 = smov [#allocation11]  }
  0x61   :  { %v1579_v12 = vld [vmem:[%s2189_s3] sm:$0xff]   ;;  %v1582_v15 = vld [vmem:[%s2189_s3 + $0x8] sm:$0xff]   ;;  %v1585_v18 = vld [vmem:[%s2189_s3 + $0x10] sm:$0xff]   ;;  %v134_v37 = vsub.s32 2, %v125_v36  ;;  %v126_v39 = vsub.s32 0, %v125_v36  ;;  %v130_v40 = vsub.s32 1, %v125_v36 }
  0x62   :  { %v1587_v19 = vld [vmem:[%s2189_s3 + $0x58] sm:$0xff]   ;;  %v1590_v22 = vld [vmem:[%s2189_s3 + $0x60] sm:$0xff]   ;;  %v1593_v25 = vld [vmem:[%s2189_s3 + $0x68] sm:$0xff]   ;;  %s1253_s18 = sshll.u32 %s1798_s17, 4  ;;  %s1254_s18 = int_to_ptr.vmem [resolvable:$true] %s1253_s18 }
  0x63   :  { %1447 = vmatpush3.bf16.msra.mxu1 %v1575_v6  ;;  %178 = vmatpush1.bf16.msra.mxu0 %v1576_v7  ;;  %v1586_v20 = vld [vmem:[%s2189_s3 + $0x98] sm:$0xff]   ;;  %v1589_v23 = vld [vmem:[%s2189_s3 + $0xa0] sm:$0xff]   ;;  %v1592_v26 = vld [vmem:[%s2189_s3 + $0xa8] sm:$0xff]   ;;  %p1763_p13 = scmp.lt.s32.totalorder %s1254_s18, %s1254_s18 }
  0x64   :  { %1452 = vmatprep.subr.bf16.mxu1 %v1795_v0  ;;  %1354 = vmatprep.subr.bf16.mxu0 %v1578_v10  ;;  %v1588_v21 = vld [vmem:[%s2189_s3 + $0x18] sm:$0xff]   ;;  %v1591_v24 = vld [vmem:[%s2189_s3 + $0x20] sm:$0xff]   ;;  %v1594_v27 = vld [vmem:[%s2189_s3 + $0x28] sm:$0xff]  }
  0x65   :  { %v1595_v28 = vld [vmem:[%s2189_s3 + $0xb0] sm:$0xff]   ;;  %v1598_v31 = vld [vmem:[%s2189_s3 + $0xb8] sm:$0xff]   ;;  %v1602_v34 = vld [vmem:[#allocation7 + $0x40] sm:$0xff]  }
  0x66   :  { %1449 = vmatmul.mubr.msk.bf16.vlgmr.msra.gmra.mrb[0].mxu1 %vm171_vm1, %v113_v9  ;;  %1270 = vmatmul.mubr.msk.bf16.vlgmr.msra.gmra.mrb[0].mxu0 %vm171_vm1, %v113_v9  ;;  %v1596_v29 = vld [vmem:[%s2189_s3 + $0x70] sm:$0xff]   ;;  %v1599_v32 = vld [vmem:[%s2189_s3 + $0x78] sm:$0xff]   ;;  %v114_v38 = vld [vmem:[#allocation5] sm:$0x7] }
  0x67   :  { %1453 = vmatpush3.bf16.msra.mxu1 %v1577_v11  ;;  %1355 = vmatpush3.bf16.msra.mxu0 %v1579_v12  ;;  %v1597_v30 = vld [vmem:[%s2189_s3 + $0x30] sm:$0xff]   ;;  %v1600_v33 = vld [vmem:[%s2189_s3 + $0x38] sm:$0xff]   ;;  %v135_v41 = vrot.slane %v114_v38, %v134_v37  ;;  %v127_v42 = vrot.slane %v114_v38, %v126_v39  ;;  %v131_v43 = vrot.slane %v114_v38, %v130_v40  ;;  %v1601_v57 = vld [vmem:[#allocation7 + $0x80] sm:$0xff]  }
  0x68   :  { %1454 = vmatprep.subr.bf16.mxu1 %v1795_v0  ;;  %1356 = vmatprep.subr.bf16.mxu0 %v1581_v13  ;;  %v1603_v61 = vld [vmem:[#allocation7] sm:$0xff]   ;;  %v1604_v63 = vld [vmem:[#allocation7 + $0x88] sm:$0xff]   ;;  %v1607_v3 = vld [vmem:[#allocation7 + $0x90] sm:$0xff]  }
  0x69   :  { %1468 = vmatprep.mubr.msk.bf16.mxu1 %vm1796_vm0, %v1795_v0  ;;  %v1605_v1 = vld [vmem:[#allocation7 + $0x48] sm:$0xff]   ;;  %v1608_v4 = vld [vmem:[#allocation7 + $0x50] sm:$0xff]   ;;  %v1610_v6 = vld [vmem:[#allocation7 + $0x98] sm:$0xff]  }
  0x6a   :  { %v1606_v2 = vld [vmem:[#allocation7 + $0x8] sm:$0xff]   ;;  %v1609_v5 = vld [vmem:[#allocation7 + $0x10] sm:$0xff]   ;;  %v1611_v7 = vld [vmem:[#allocation7 + $0x58] sm:$0xff]  }
  0x6b   :  { %1455 = vmatpush3.bf16.msra.mxu1 %v1580_v14  ;;  %1357 = vmatpush3.bf16.msra.mxu0 %v1582_v15  ;;  %v1612_v8 = vld [vmem:[#allocation7 + $0x18] sm:$0xff]   ;;  %v1613_v9 = vld [vmem:[#allocation7 + $0xa0] sm:$0xff]   ;;  %v1616_v12 = vld [vmem:[#allocation7 + $0xa8] sm:$0xff]  }
  0x6c   :  { %1456 = vmatprep.subr.bf16.mxu1 %v1795_v0  ;;  %1358 = vmatprep.subr.bf16.mxu0 %v1584_v16  ;;  %v1614_v10 = vld [vmem:[#allocation7 + $0x60] sm:$0xff]   ;;  %v1617_v13 = vld [vmem:[#allocation7 + $0x68] sm:$0xff]   ;;  %v1619_v15 = vld [vmem:[#allocation7 + $0xb0] sm:$0xff]  }
  0x6d   :  { %v1615_v11 = vld [vmem:[#allocation7 + $0x20] sm:$0xff]   ;;  %v1618_v14 = vld [vmem:[#allocation7 + $0x28] sm:$0xff]   ;;  %v1620_v16 = vld [vmem:[#allocation7 + $0x70] sm:$0xff]  }
  0x6e   :  { %v1639_v35 = vld [vmem:[%s2192_s6 + $0x38] sm:$0xff]  }
  0x6f   :  { %1457 = vmatpush3.bf16.msra.mxu1 %v1583_v17  ;;  %1359 = vmatpush3.bf16.msra.mxu0 %v1585_v18  ;;  %v1621_v17 = vld [vmem:[#allocation7 + $0x30] sm:$0xff]   ;;  %v1622_v18 = vld [vmem:[#allocation7 + $0xb8] sm:$0xff]  }
  0x70   :  { %1458 = vmatprep.subr.bf16.mxu1 %v1795_v0  ;;  %1360 = vmatprep.subr.bf16.mxu0 %v1587_v19  ;;  %v1623_v19 = vld [vmem:[#allocation7 + $0x78] sm:$0xff]  }
  0x71   :  { %v1640_v36 = vld [vmem:[%s2193_s7 + $0x38] sm:$0xff]  }
  0x73   :  { %1459 = vmatpush3.bf16.msra.mxu1 %v1586_v20  ;;  %1361 = vmatpush3.bf16.msra.mxu0 %v1588_v21  ;;  %v1624_v20 = vld [vmem:[#allocation7 + $0x38] sm:$0xff]  }
  0x74   :  { %1460 = vmatprep.subr.bf16.mxu1 %v1795_v0  ;;  %1362 = vmatprep.subr.bf16.mxu0 %v1590_v22  ;;  %v1625_v21 = vld [vmem:[%s2192_s6] sm:$0xff]  }
  0x75   :  { %v1626_v22 = vld [vmem:[%s2193_s7] sm:$0xff]  }
  0x77   :  { %1461 = vmatpush3.bf16.msra.mxu1 %v1589_v23  ;;  %1363 = vmatpush3.bf16.msra.mxu0 %v1591_v24  ;;  %v1627_v23 = vld [vmem:[%s2192_s6 + $0x8] sm:$0xff]  }
  0x78   :  { %1462 = vmatprep.subr.bf16.mxu1 %v1795_v0  ;;  %1364 = vmatprep.subr.bf16.mxu0 %v1593_v25  ;;  %v1628_v24 = vld [vmem:[%s2193_s7 + $0x8] sm:$0xff]   ;;  %v1629_v25 = vld [vmem:[%s2192_s6 + $0x10] sm:$0xff]  }
  0x7b   :  { %1463 = vmatpush3.bf16.msra.mxu1 %v1592_v26  ;;  %1365 = vmatpush3.bf16.msra.mxu0 %v1594_v27  ;;  %v1630_v26 = vld [vmem:[%s2193_s7 + $0x10] sm:$0xff]   ;;  %v1631_v27 = vld [vmem:[%s2192_s6 + $0x18] sm:$0xff]  }
  0x7c   :  { %1464 = vmatprep.subr.bf16.mxu1 %v1795_v0  ;;  %1366 = vmatprep.subr.bf16.mxu0 %v1596_v29  ;;  %v1633_v29 = vld [vmem:[%s2192_s6 + $0x20] sm:$0xff]  }
  0x7f   :  { %1465 = vmatpush3.bf16.msra.mxu1 %v1595_v28  ;;  %1367 = vmatpush3.bf16.msra.mxu0 %v1597_v30  ;;  %v1632_v28 = vld [vmem:[%s2193_s7 + $0x18] sm:$0xff]   ;;  %v1634_v30 = vld [vmem:[%s2193_s7 + $0x20] sm:$0xff]  }
  0x80   :  { %1466 = vmatprep.subr.bf16.mxu1 %v1795_v0  ;;  %1368 = vmatprep.subr.bf16.mxu0 %v1599_v32  ;;  %v1636_v32 = vld [vmem:[%s2193_s7 + $0x28] sm:$0xff]  }
  0x83   :  { %1467 = vmatpush3.bf16.msra.mxu1 %v1598_v31  ;;  %1369 = vmatpush3.bf16.msra.mxu0 %v1600_v33  ;;  %v1635_v31 = vld [vmem:[%s2192_s6 + $0x28] sm:$0xff]   ;;  %v1637_v33 = vld [vmem:[%s2192_s6 + $0x30] sm:$0xff]  }
  0x84   :  { %1472 = vmatprep.subr.bf16.mxu1 %v1795_v0  ;;  %1385 = vmatprep.subr.bf16.mxu0 %v1602_v34  ;;  %v1638_v34 = vld [vmem:[%s2193_s7 + $0x30] sm:$0xff]  }
 0x139   :  { %v250_v44 = vpop.f32.mrb[0].mxu1  ;;  %v209_v46 = vpop.f32.mrb[0].mxu0 }
 0x13a   :  { %v251_v45 = vadd.f32 %v250_v44, %v135_v41  ;;  %v1450_v47 = vpop.f32.mrb[1].mxu1  ;;  %v210_v48 = vadd.f32 %v209_v46, %v127_v42  ;;  %v211_v49 = vpop.f32.mrb[1].mxu0 }
 0x13b   :  { %v253_v50 = vpop.f32.mrb[2].mxu1  ;;  %v212_v52 = vadd.f32 %v211_v49, %v131_v43  ;;  %v213_v53 = vpop.f32.mrb[2].mxu0  ;;  %v1272_v43 = vld [vmem:[%s2191_s5] ss:$0 sm:$0xff] }
 0x13c   :  { %v258_v51 = vmax.f32 %v251_v45, 0.0  ;;  %v1451_v54 = vpop.f32.mrb[3].mxu1  ;;  %v256_v55 = vmax.f32 %v210_v48, 0.0  ;;  %v214_v56 = vpop.f32.mrb[3].mxu0 }
 0x13d   :  { %v257_v59 = vmax.f32 %v212_v52, 0.0 }
 0x13e   :  { %v261_v58 = vpack.c.bf16 %v258_v51, %v258_v51  ;;  %v259_v62 = vpack.c.bf16 %v256_v55, %v256_v55 }
 0x13f   :  { %v260_v60 = vpack.c.bf16 %v257_v59, %v257_v59 }
 0x140   :  { %1469 = vmatmul.mubr.bf16.vlgmr.msra.gmra.mrb[4].mxu1 %v261_v58 }
 0x141   :  { %1473 = vmatpush3.bf16.msra.mxu1 %v1601_v57  ;;  %1488 = vmatprep.mubr.msk.bf16.mxu1 %vm1796_vm0, %v1795_v0 }
 0x142   :  { %493 = vmatprep.mubr.bf16.mxu0 %v260_v60  ;;  %1474 = vmatprep.subr.bf16.mxu1 %v1795_v0 }
 0x143   :  { %494 = vmatmul.mubr.bf16.vlgmr.msra.gmra.mrb[4].mxu0 %v259_v62 }
 0x144   :  { %1386 = vmatpush3.bf16.msra.mxu0 %v1603_v61  ;;  %765 = vmatprep.mubr.bf16.mxu0 %v260_v60 }
 0x145   :  { %1475 = vmatpush3.bf16.msra.mxu1 %v1604_v63  ;;  %1387 = vmatprep.subr.bf16.mxu0 %v1605_v1  ;;  %v1642_v1 = vld [vmem:[%s2195_s9 + $0x8] sm:$0xff]  }
 0x146   :  { %1476 = vmatprep.subr.bf16.mxu1 %v1795_v0 }
 0x148   :  { %1388 = vmatpush3.bf16.msra.mxu0 %v1606_v2  ;;  %v1643_v2 = vld [vmem:[%s2195_s9 + $0x10] sm:$0xff]  }
 0x149   :  { %1477 = vmatpush3.bf16.msra.mxu1 %v1607_v3  ;;  %1389 = vmatprep.subr.bf16.mxu0 %v1608_v4  ;;  %v1644_v3 = vld [vmem:[%s2195_s9 + $0x18] sm:$0xff]   ;;  %v1645_v4 = vld [vmem:[%s2197_s11] sm:$0xff]  }
 0x14a   :  { %1478 = vmatprep.subr.bf16.mxu1 %v1795_v0 }
 0x14c   :  { %1390 = vmatpush3.bf16.msra.mxu0 %v1609_v5  ;;  %v1321_v5 = vld [vmem:[#allocation8] ss:$0 sm:$0xff] }
 0x14d   :  { %1479 = vmatpush3.bf16.msra.mxu1 %v1610_v6  ;;  %1391 = vmatprep.subr.bf16.mxu0 %v1611_v7 }
 0x14e   :  { %1480 = vmatprep.subr.bf16.mxu1 %v1795_v0 }
 0x150   :  { %1392 = vmatpush3.bf16.msra.mxu0 %v1612_v8 }
 0x151   :  { %1481 = vmatpush3.bf16.msra.mxu1 %v1613_v9  ;;  %1393 = vmatprep.subr.bf16.mxu0 %v1614_v10 }
 0x152   :  { %1482 = vmatprep.subr.bf16.mxu1 %v1795_v0 }
 0x154   :  { %1394 = vmatpush3.bf16.msra.mxu0 %v1615_v11 }
 0x155   :  { %1483 = vmatpush3.bf16.msra.mxu1 %v1616_v12  ;;  %1395 = vmatprep.subr.bf16.mxu0 %v1617_v13 }
 0x156   :  { %1484 = vmatprep.subr.bf16.mxu1 %v1795_v0 }
 0x158   :  { %1396 = vmatpush3.bf16.msra.mxu0 %v1618_v14 }
 0x159   :  { %1485 = vmatpush3.bf16.msra.mxu1 %v1619_v15  ;;  %1397 = vmatprep.subr.bf16.mxu0 %v1620_v16 }
 0x15a   :  { %1486 = vmatprep.subr.bf16.mxu1 %v1795_v0 }
 0x15c   :  { %1398 = vmatpush3.bf16.msra.mxu0 %v1621_v17 }
 0x15d   :  { %1487 = vmatpush3.bf16.msra.mxu1 %v1622_v18  ;;  %1399 = vmatprep.subr.bf16.mxu0 %v1623_v19  ;;  %v1646_v19 = vld [vmem:[%s2197_s11 + $0x8] sm:$0xff]  }
 0x15e   :  { %1512 = vmatprep.subr.bf16.mxu1 %v1795_v0 }
 0x160   :  { %1400 = vmatpush3.bf16.msra.mxu0 %v1624_v20  ;;  %1489 = vmatmul.mubr.bf16.vlgmr.msra.gmra.mrb[8].mxu1 %v261_v58  ;;  %v1338_v20 = vld [vmem:[#allocation10] ss:$0 sm:$0xff] }
 0x161   :  { %1492 = vmatprep.subr.bf16.mxu0 %v1795_v0  ;;  %1528 = vmatprep.mubr.msk.bf16.mxu1 %vm1796_vm0, %v1795_v0 }
 0x162   :  { %1513 = vmatpush3.bf16.msra.mxu1 %v1626_v22 }
 0x163   :  { %766 = vmatmul.mubr.bf16.vlgmr.msra.gmra.mrb[8].mxu0 %v259_v62  ;;  %1514 = vmatprep.subr.bf16.mxu1 %v1795_v0  ;;  %v1641_v62 = vld [vmem:[%s2195_s9] sm:$0xff]  }
 0x164   :  { %1508 = vmatprep.mubr.msk.bf16.mxu0 %vm1796_vm0, %v1795_v0  ;;  %1493 = vmatpush3.bf16.msra.mxu0 %v1625_v21 }
 0x165   :  { %1494 = vmatprep.subr.bf16.mxu0 %v1795_v0 }
 0x166   :  { %1515 = vmatpush3.bf16.msra.mxu1 %v1628_v24 }
 0x167   :  { %1516 = vmatprep.subr.bf16.mxu1 %v1795_v0 }
 0x168   :  { %1495 = vmatpush3.bf16.msra.mxu0 %v1627_v23 }
 0x169   :  { %1496 = vmatprep.subr.bf16.mxu0 %v1795_v0 }
 0x16a   :  { %1517 = vmatpush3.bf16.msra.mxu1 %v1630_v26 }
 0x16b   :  { %1518 = vmatprep.subr.bf16.mxu1 %v1795_v0 }
 0x16c   :  { %1497 = vmatpush3.bf16.msra.mxu0 %v1629_v25 }
 0x16d   :  { %1498 = vmatprep.subr.bf16.mxu0 %v1795_v0 }
 0x16e   :  { %1519 = vmatpush3.bf16.msra.mxu1 %v1632_v28 }
 0x16f   :  { %1520 = vmatprep.subr.bf16.mxu1 %v1795_v0 }
 0x170   :  { %1499 = vmatpush3.bf16.msra.mxu0 %v1631_v27  ;;  %v1647_v27 = vld [vmem:[%s2199_s13] sm:$0xff]  }
 0x171   :  { %1500 = vmatprep.subr.bf16.mxu0 %v1795_v0 }
 0x172   :  { %1521 = vmatpush3.bf16.msra.mxu1 %v1634_v30 }
 0x173   :  { %1522 = vmatprep.subr.bf16.mxu1 %v1795_v0 }
 0x174   :  { %1501 = vmatpush3.bf16.msra.mxu0 %v1633_v29  ;;  %v1344_v29 = vld [vmem:[%s2198_s12] ss:$0 sm:$0xff]  ;;  %s1758_s12 = scalar_lea.vmem %s1254_s18, 32 }
 0x175   :  { %1502 = vmatprep.subr.bf16.mxu0 %v1795_v0  ;;  %p1759_p12 = scmp.ne.s32.totalorder %s1254_s18, %s1758_s12  ;;  %p1764_p0 = scmp.lt.s32.totalorder %s1758_s12, %s1758_s12 }
 0x176   :  { %1523 = vmatpush3.bf16.msra.mxu1 %v1636_v32 }
 0x177   :  { %1524 = vmatprep.subr.bf16.mxu1 %v1795_v0  ;;  %p1765_p1 = por %p1764_p0, %p1763_p13 }
 0x178   :  { %1503 = vmatpush3.bf16.msra.mxu0 %v1635_v31 }
 0x179   :  { %1504 = vmatprep.subr.bf16.mxu0 %v1795_v0  ;;  %p1766_p2 = pnand %p1765_p1, %p1759_p12 }
 0x17a   :  { %1525 = vmatpush3.bf16.msra.mxu1 %v1638_v34 }
 0x17b   :  { %1526 = vmatprep.subr.bf16.mxu1 %v1795_v0 }
 0x17c   :  { %1505 = vmatpush3.bf16.msra.mxu0 %v1637_v33 }
 0x17d   :  { %1506 = vmatprep.subr.bf16.mxu0 %v1795_v0 }
 0x17e   :  { %1527 = vmatpush3.bf16.msra.mxu1 %v1640_v36 }
 0x17f   :  { %1544 = vmatprep.subr.bf16.mxu1 %v1795_v0 }
 0x180   :  { %1507 = vmatpush3.bf16.msra.mxu0 %v1639_v35 }
 0x181   :  { %1532 = vmatprep.subr.bf16.mxu0 %v1795_v0 }
 0x213   :  { %v535_v37 = vpop.f32.mrb[4].mxu1 }
 0x214   :  { %v1470_v38 = vpop.f32.mrb[5].mxu1 }
 0x215   :  { %v538_v39 = vpop.f32.mrb[6].mxu1 }
 0x216   :  { %v1370_v40 = vpop.f32.mrb[4].mxu0  ;;  %v1471_v41 = vpop.f32.mrb[7].mxu1 }
 0x217   :  { %v1371_v42 = vpop.f32.mrb[5].mxu0 }
 0x218   :  { %v1372_v44 = vadd.f32 %v1371_v42, %v1370_v40  ;;  %v1373_v45 = vpop.f32.mrb[6].mxu0 }
 0x219   :  { %v1374_v46 = vpop.f32.mrb[7].mxu0 }
 0x21a   :  { %v496_v47 = vadd.f32 %v1372_v44, %v1272_v43 }
 0x21c   :  { %v536_v48 = vadd.f32 %v535_v37, %v496_v47  ;;  %v1348_v37 = vld [vmem:[%s2200_s14] ss:$0 sm:$0xff] }
 0x233   :  { %v807_v49 = vpop.f32.mrb[8].mxu1 }
 0x234   :  { %v1490_v50 = vpop.f32.mrb[9].mxu1 }
 0x235   :  { %v810_v51 = vpop.f32.mrb[10].mxu1 }
 0x236   :  { %v1401_v52 = vpop.f32.mrb[8].mxu0  ;;  %v1491_v53 = vpop.f32.mrb[11].mxu1 }
 0x237   :  { %v1402_v54 = vpop.f32.mrb[9].mxu0 }
 0x238   :  { %v1403_v55 = vadd.f32 %v1402_v54, %v1401_v52  ;;  %v1404_v56 = vpop.f32.mrb[10].mxu0 }
 0x239   :  { %v1405_v57 = vpop.f32.mrb[11].mxu0 }
 0x23a   :  { %v768_v58 = vadd.f32 %v1403_v55, %v1272_v43 }
 0x23c   :  { %v808_v59 = vadd.f32 %v807_v49, %v768_v58 }
 0x23e   :  { %v813_v60 = vmax.f32 %v536_v48, %v808_v59 }
 0x240   :  { %v814_v61 = vmax.f32 %v813_v60, 0.0 }
 0x242   :  { %v815_v63 = vpack.c.bf16 %v814_v61, %v814_v61 }
 0x244   :  { %1509 = vmatmul.mubr.bf16.vlgmr.msra.gmra.mrb[12].mxu0 %v815_v63  ;;  %1529 = vmatmul.mubr.bf16.vlgmr.msra.gmra.mrb[12].mxu1 %v815_v63 }
 0x245   :  { %1533 = vmatpush3.bf16.msra.mxu0 %v1641_v62  ;;  %1540 = vmatprep.mubr.msk.bf16.mxu0 %vm1796_vm0, %v1795_v0 }
 0x246   :  { %1534 = vmatprep.subr.bf16.mxu0 %v1795_v0  ;;  %1548 = vmatprep.mubr.msk.bf16.mxu1 %vm1796_vm0, %v1795_v0 }
 0x247   :  { %1545 = vmatpush3.bf16.msra.mxu1 %v1645_v4 }
 0x248   :  { %1546 = vmatprep.subr.bf16.mxu1 %v1795_v0 }
 0x249   :  { %1535 = vmatpush3.bf16.msra.mxu0 %v1642_v1 }
 0x24a   :  { %1536 = vmatprep.subr.bf16.mxu0 %v1795_v0 }
 0x24b   :  { %1547 = vmatpush3.bf16.msra.mxu1 %v1646_v19 }
 0x24c   :  { %1552 = vmatprep.subr.bf16.mxu1 %v1795_v0 }
 0x24d   :  { %1537 = vmatpush3.bf16.msra.mxu0 %v1643_v2 }
 0x24e   :  { %1538 = vmatprep.subr.bf16.mxu0 %v1795_v0 }
 0x251   :  { %1539 = vmatpush3.bf16.msra.mxu0 %v1644_v3 }
 0x317   :  { %v921_v6 = vpop.f32.mrb[12].mxu0  ;;  %v1025_v7 = vpop.f32.mrb[12].mxu1 }
 0x318   :  { %v922_v8 = vadd.f32 %v1321_v5, %v921_v6  ;;  %v1026_v9 = vadd.f32 %v1321_v5, %v1025_v7  ;;  %v1510_v10 = vpop.f32.mrb[13].mxu0  ;;  %v1530_v11 = vpop.f32.mrb[13].mxu1 }
 0x319   :  { %v924_v12 = vpop.f32.mrb[14].mxu0  ;;  %v1028_v13 = vpop.f32.mrb[14].mxu1 }
 0x31a   :  { %v1031_v14 = vmax.f32 %v922_v8, %v1026_v9  ;;  %v1511_v15 = vpop.f32.mrb[15].mxu0  ;;  %v1531_v16 = vpop.f32.mrb[15].mxu1 }
 0x31c   :  { %v1032_v17 = vmax.f32 %v1031_v14, 0.0 }
 0x31e   :  { %v1033_v18 = vpack.c.bf16 %v1032_v17, %v1032_v17 }
 0x320   :  { %1541 = vmatmul.mubr.msk.bf16.vlgmr.msra.gmra.mrb[16].mxu0 %vm1073_vm2, %v1033_v18 }
 0x3f3   :  { %v1111_v21 = vpop.f32.mrb[16].mxu0 }
 0x3f4   :  { %v1112_v22 = vadd.f32 %v1338_v20, %v1111_v21  ;;  %v1542_v23 = vpop.f32.mrb[17].mxu0 }
 0x3f5   :  { %v1114_v24 = vpop.f32.mrb[18].mxu0 }
 0x3f6   :  { %v1117_v25 = vmax.f32 %v1112_v22, 0.0  ;;  %v1543_v26 = vpop.f32.mrb[19].mxu0 }
 0x3f8   :  { %v1118_v28 = vpack.c.bf16 %v1117_v25, %v1117_v25 }
 0x3fa   :  { %1549 = vmatmul.mubr.msk.bf16.vlgmr.msra.gmra.mrb[16].mxu1 %vm171_vm1, %v1118_v28 }
 0x3fb   :  { %1553 = vmatpush3.bf16.msra.mxu1 %v1647_v27  ;;  %1554 = vmatprep.mubr.msk.bf16.mxu1 %vm1796_vm0, %v1795_v0 }
 0x4cd   :  { %v1179_v30 = vpop.f32.mrb[16].mxu1 }
 0x4ce   :  { %v1180_v31 = vadd.f32 %v1344_v29, %v1179_v30  ;;  %v1550_v32 = vpop.f32.mrb[17].mxu1 }
 0x4cf   :  { %v1182_v33 = vpop.f32.mrb[18].mxu1 }
 0x4d0   :  { %v1185_v34 = vmax.f32 %v1180_v31, 0.0  ;;  %v1551_v35 = vpop.f32.mrb[19].mxu1 }
 0x4d2   :  { %v1186_v36 = vpack.c.bf16 %v1185_v34, %v1185_v34 }
 0x4d4   :  { %1555 = vmatmul.mubr.msk.bf16.vlgmr.msra.gmra.mrb[20].mxu1 %vm1202_vm3, %v1186_v36 }
 0x5a7   :  { %v1240_v0 = vpop.f32.mrb[20].mxu1 }
 0x5a8   :  { %v1241_v38 = vadd.f32 %v1348_v37, %v1240_v0  ;;  %v1556_v39 = vpop.f32.mrb[21].mxu1 }
 0x5a9   :  { %v1243_v40 = vpop.f32.mrb[22].mxu1 }
 0x5aa   :  { %1246 = vst [vmem:[#allocation11] sm:$0x3] %v1241_v38  ;;  %v1557_v41 = vpop.f32.mrb[23].mxu1 }
 0x5ab   :  { %1769 = shalt.err (!%p1766_p2)
}
 0x5ac   :  { %s1770_s14 = scalar_lea.hbm %s2201_s15, 32 }
 0x5ad   :  { %p1771_p3 = scmp.ne.s32.totalorder %s2201_s15, %s1770_s14  ;;  %p1774_p4 = scmp.lt.u32.totalorder %s1770_s14, %s2201_s15 }
 0x5af   :  { %p1776_p5 = pnand %p1774_p4, %p1771_p3 }
 0x5b1   :  { %1779 = shalt.err (!%p1776_p5)
}
 0x5b2   :  { %1256 = dma.vmem_to_hbm [thread:$0]  %s1254_s18, 32, %s2201_s15, [#allocation4]  }
 0x5b3   :  { %1786 = dma.done.wait [#allocation4], 32  }
 0x5b4   :  { %1787 = vsyncadd [#allocation4], 4294967264 }
 0x5b5   :  { %1260 = vsyncpa [#allocation3], 1 }
 0x5b6   :  { %1261 = vsyncpa [#allocation6], 1 }
 0x5b7   :  { %1262 = vsyncpa [#allocation9], 1 }
 0x5b8   :  { %1263 = vsyncpa [#allocation4], 1 }

</bundles_post_ra>
